<compile_context>
chip_gen: v7x
topology: tpu7x:2x2x1
jax: 0.10.0
libtpu: 0.0.40
codegen_flags: <defaults>
</compile_context>

<pallas_src>
import jax
import jax.numpy as jnp
from jax.experimental import pallas as pl
from jax.experimental.pallas import tpu as pltpu  # noqa: F401  (kept for TPU-specific tuning hooks)


# ----------------------------------------------------------------------------
# Fused Pallas kernel: RuleConvolution -> RuleAggregation -> flatten -> Linear
# ----------------------------------------------------------------------------
def _fused_rulegnn_kernel(x_ref, cw_ref, cb_ref, aw_ref, ab_ref, w4_ref, b_ref,
                          o_ref):
    # x_ref : (C, N, F)   cw_ref: (C, N, N)   cb_ref: (C, N, F)
    # aw_ref: (C, M, N)   ab_ref: (C, M, F)
    # w4_ref: (C, M, F, OP)  -- readout Linear, rows in flatten order (c, m, f),
    #                           output lanes zero-padded to OP (multiple of 128)
    # b_ref : (1, OP)        o_ref: (1, OP)
    C, M, F, OP = w4_ref.shape

    # layer 0: RuleConvolutionLayer + Tanh (dropout == identity in eval)
    h1 = jnp.tanh(
        jnp.einsum('cmn,cnf->cmf', cw_ref[...], x_ref[...],
                   preferred_element_type=jnp.float32) + cb_ref[...])

    # layer 1: RuleAggregationLayer + Tanh
    h2 = jnp.tanh(
        jnp.einsum('cmn,cnf->cmf', aw_ref[...], h1,
                   preferred_element_type=jnp.float32) + ab_ref[...])

    # layer 2: flatten -> nn.Linear -> Tanh.
    #   flatten(h2) @ W_lin  ==  sum_{c,m} h2[c, m, :] @ W_lin[(c*M+m)*F : ..., :]
    # expressed as fully-unrolled per-(c, m) row contractions against the
    # lane-dense (F, OP) weight tiles (avoids an in-kernel reshape).
    acc = b_ref[...].astype(jnp.float32)                  # (1, OP)
    for c in range(C):                                    # static, tiny, unrolled
        for m in range(M):
            acc = acc + jnp.dot(h2[c, m:m + 1, :], w4_ref[c, m],
                                preferred_element_type=jnp.float32)
    o_ref[...] = jnp.tanh(acc).astype(o_ref.dtype)


def rulegnn_forward(x, pos, params, *, out_dim):
    """Single-launch fused forward. Returns flatten(y) of shape (out_dim,)."""
    # pos is consumed at parameter-materialization time (rule map); the layer
    # compute itself does not need it any further.
    del pos
    op = params["lin_b_pad"].shape[-1]
    y_pad = pl.pallas_call(
        _fused_rulegnn_kernel,
        out_shape=jax.ShapeDtypeStruct((1, op), x.dtype),
    )(x, params["conv_w"], params["conv_b"],
      params["agg_w"], params["agg_b"],
      params["lin_w4"], params["lin_b_pad"])
    return y_pad[0, :out_dim]


# ----------------------------------------------------------------------------
# Parameter construction (deterministic, synthetic)
# ----------------------------------------------------------------------------
def make_rule_weights(key, pos, channels, out_rows, n_rules, scale=0.1):
    """RuleGNN weight sharing: W[c, i, j] = params[c, rule(i, j)], rule map
    derived from node positions/labels.  Materialized once at init time.
    # TODO(synk): for large N, gather inside the kernel from the small
    # (C, n_rules) parameter vector (SMEM/VMEM) instead of materializing a
    # dense (C, out_rows, N) HBM array.
    """
    n_nodes = pos.shape[0]
    p = scale * jax.random.normal(key, (channels, n_rules), dtype=jnp.float32)
    row_id = jnp.arange(out_rows)[:, None]
    rule_idx = (row_id + pos[None, :n_nodes]) % n_rules          # (out_rows, N)
    return p[:, rule_idx]                                        # (C, out_rows, N)


def init_params(key, channels, n_nodes, feat_dim, agg_out, out_dim, pos):
    keys = jax.random.split(key, 6)
    conv_w = make_rule_weights(keys[0], pos, channels, n_nodes, n_rules=7)
    conv_b = 0.05 * jax.random.normal(keys[1], (channels, n_nodes, feat_dim),
                                      dtype=jnp.float32)
    agg_w = make_rule_weights(keys[2], pos, channels, agg_out, n_rules=5)
    agg_b = 0.05 * jax.random.normal(keys[3], (channels, agg_out, feat_dim),
                                     dtype=jnp.float32)
    d = channels * agg_out * feat_dim
    lin_w = 0.1 * jax.random.normal(keys[4], (d, out_dim), dtype=jnp.float32)
    lin_b = 0.05 * jax.random.normal(keys[5], (out_dim,), dtype=jnp.float32)

    # Lane-dense readout slab, built once: pad the output dim to a multiple of
    # 128 and lay the weight out as (C, M, F, OP) so w4[c,m,f,o] corresponds to
    # lin_w[(c*M+m)*F + f, o] (matches torch.flatten row-major order).
    op = ((out_dim + 127) // 128) * 128
    lin_w_pad = jnp.zeros((d, op), jnp.float32).at[:, :out_dim].set(lin_w)
    lin_b_pad = jnp.zeros((1, op), jnp.float32).at[0, :out_dim].set(lin_b)
    lin_w4 = lin_w_pad.reshape(channels, agg_out, feat_dim, op)

    return dict(conv_w=conv_w, conv_b=conv_b,
                agg_w=agg_w, agg_b=agg_b,
                lin_w4=lin_w4, lin_b_pad=lin_b_pad)


# ----------------------------------------------------------------------------
if __name__ == "__main__":
    channels = 4        # para 'channels'
    n_nodes = 16        # graph size
    feat_dim = 8        # graph_data.input_feature_dimension
    agg_out = 4         # aggregation layer out_dim
    out_dim = 2         # graph_data.output_feature_dimension (=> linear appended)

    root = jax.random.PRNGKey(0)
    k_x, k_pos, k_par = jax.random.split(root, 3)

    # node feature tensor, channel-major (C, N, F)
    x = jax.random.normal(k_x, (channels, n_nodes, feat_dim), dtype=jnp.float32)
    # node "positions" / labels used by the rules
    # TODO(synk): exact RuleGNNLayers rule/label bookkeeping is dataset-specific;
    # a synthetic position-derived rule map is used instead.
    pos = jax.random.randint(k_pos, (n_nodes,), 0, 5, dtype=jnp.int32)

    params = init_params(k_par, channels, n_nodes, feat_dim, agg_out, out_dim, pos)

    fwd = jax.jit(lambda x_, pos_, params_: rulegnn_forward(
        x_, pos_, params_, out_dim=out_dim))
    out = fwd(x, pos, params)
    out = jax.block_until_ready(out)
    assert out.shape == (out_dim,)
    print("KERNEL_OK")
</pallas_src>

<mosaic_0001>
module attributes {stable_mosaic.version = 11 : i64} {
  func.func @_fused_rulegnn_kernel(%arg0: memref<4x16x8xf32, #tpu.memory_space<vmem>>, %arg1: memref<4x16x16xf32, #tpu.memory_space<vmem>>, %arg2: memref<4x16x8xf32, #tpu.memory_space<vmem>>, %arg3: memref<4x4x16xf32, #tpu.memory_space<vmem>>, %arg4: memref<4x4x8xf32, #tpu.memory_space<vmem>>, %arg5: memref<4x4x8x128xf32, #tpu.memory_space<vmem>>, %arg6: memref<1x128xf32, #tpu.memory_space<vmem>>, %arg7: memref<1x128xf32, #tpu.memory_space<vmem>>) attributes {dimension_semantics = [], scalar_prefetch = 0 : i64, scratch_operands = 0 : i64, tpu.core_type = #tpu.core_type<tc>} {
    %c0 = arith.constant 0 : index
    %c0_0 = arith.constant 0 : index
    %c0_1 = arith.constant 0 : index
    %0 = vector.load %arg1[%c0, %c0_0, %c0_1] : memref<4x16x16xf32, #tpu.memory_space<vmem>>, vector<4x16x16xf32>
    %c0_2 = arith.constant 0 : index
    %c0_3 = arith.constant 0 : index
    %c0_4 = arith.constant 0 : index
    %1 = vector.load %arg0[%c0_2, %c0_3, %c0_4] : memref<4x16x8xf32, #tpu.memory_space<vmem>>, vector<4x16x8xf32>
    "tpu.trace_start"() <{level = 10 : i32, message = "cmn,cnf->cmf"}> : () -> ()
    %cst = arith.constant dense<0.000000e+00> : vector<4x16x8xf32>
    %2 = tpu.matmul %0, %1, %cst {dimension_numbers = #tpu.dot_dimension_numbers<[2], [1], [1], [2], [0, 0, 0, 1, 1, 2], [0], [0]>} : vector<4x16x16xf32>, vector<4x16x8xf32>, vector<4x16x8xf32> -> vector<4x16x8xf32>
    "tpu.trace_stop"() : () -> ()
    %c0_5 = arith.constant 0 : index
    %c0_6 = arith.constant 0 : index
    %c0_7 = arith.constant 0 : index
    %3 = vector.load %arg2[%c0_5, %c0_6, %c0_7] : memref<4x16x8xf32, #tpu.memory_space<vmem>>, vector<4x16x8xf32>
    %4 = arith.addf %2, %3 : vector<4x16x8xf32>
    %5 = math.tanh %4 : vector<4x16x8xf32>
    %c0_8 = arith.constant 0 : index
    %c0_9 = arith.constant 0 : index
    %c0_10 = arith.constant 0 : index
    %6 = vector.load %arg3[%c0_8, %c0_9, %c0_10] : memref<4x4x16xf32, #tpu.memory_space<vmem>>, vector<4x4x16xf32>
    "tpu.trace_start"() <{level = 10 : i32, message = "cmn,cnf->cmf"}> : () -> ()
    %cst_11 = arith.constant dense<0.000000e+00> : vector<4x4x8xf32>
    %7 = tpu.matmul %6, %5, %cst_11 {dimension_numbers = #tpu.dot_dimension_numbers<[2], [1], [1], [2], [0, 0, 0, 1, 1, 2], [0], [0]>} : vector<4x4x16xf32>, vector<4x16x8xf32>, vector<4x4x8xf32> -> vector<4x4x8xf32>
    "tpu.trace_stop"() : () -> ()
    %c0_12 = arith.constant 0 : index
    %c0_13 = arith.constant 0 : index
    %c0_14 = arith.constant 0 : index
    %8 = vector.load %arg4[%c0_12, %c0_13, %c0_14] : memref<4x4x8xf32, #tpu.memory_space<vmem>>, vector<4x4x8xf32>
    %9 = arith.addf %7, %8 : vector<4x4x8xf32>
    %10 = math.tanh %9 : vector<4x4x8xf32>
    %c0_15 = arith.constant 0 : index
    %c0_16 = arith.constant 0 : index
    %11 = vector.load %arg6[%c0_15, %c0_16] : memref<1x128xf32, #tpu.memory_space<vmem>>, vector<1x128xf32>
    %12 = vector.extract_strided_slice %10 {offsets = [0, 0, 0], sizes = [1, 1, 8], strides = [1, 1, 1]} : vector<4x4x8xf32> to vector<1x1x8xf32>
    %13 = vector.shape_cast %12 : vector<1x1x8xf32> to vector<1x8xf32>
    %c0_17 = arith.constant 0 : index
    %c0_18 = arith.constant 0 : index
    %c0_19 = arith.constant 0 : index
    %c0_20 = arith.constant 0 : index
    %14 = vector.load %arg5[%c0_17, %c0_18, %c0_19, %c0_20] : memref<4x4x8x128xf32, #tpu.memory_space<vmem>>, vector<1x1x8x128xf32>
    %15 = vector.shape_cast %14 : vector<1x1x8x128xf32> to vector<8x128xf32>
    %cst_21 = arith.constant dense<0.000000e+00> : vector<1x128xf32>
    %16 = tpu.matmul %13, %15, %cst_21 {dimension_numbers = #tpu.dot_dimension_numbers<[1], [0], [0], [1], [0, 0, 1, 1], [], []>} : vector<1x8xf32>, vector<8x128xf32>, vector<1x128xf32> -> vector<1x128xf32>
    %17 = arith.addf %11, %16 : vector<1x128xf32>
    %18 = vector.extract_strided_slice %10 {offsets = [0, 1, 0], sizes = [1, 1, 8], strides = [1, 1, 1]} : vector<4x4x8xf32> to vector<1x1x8xf32>
    %19 = vector.shape_cast %18 : vector<1x1x8xf32> to vector<1x8xf32>
    %c0_22 = arith.constant 0 : index
    %c1 = arith.constant 1 : index
    %c0_23 = arith.constant 0 : index
    %c0_24 = arith.constant 0 : index
    %20 = vector.load %arg5[%c0_22, %c1, %c0_23, %c0_24] : memref<4x4x8x128xf32, #tpu.memory_space<vmem>>, vector<1x1x8x128xf32>
    %21 = vector.shape_cast %20 : vector<1x1x8x128xf32> to vector<8x128xf32>
    %cst_25 = arith.constant dense<0.000000e+00> : vector<1x128xf32>
    %22 = tpu.matmul %19, %21, %cst_25 {dimension_numbers = #tpu.dot_dimension_numbers<[1], [0], [0], [1], [0, 0, 1, 1], [], []>} : vector<1x8xf32>, vector<8x128xf32>, vector<1x128xf32> -> vector<1x128xf32>
    %23 = arith.addf %17, %22 : vector<1x128xf32>
    %24 = vector.extract_strided_slice %10 {offsets = [0, 2, 0], sizes = [1, 1, 8], strides = [1, 1, 1]} : vector<4x4x8xf32> to vector<1x1x8xf32>
    %25 = vector.shape_cast %24 : vector<1x1x8xf32> to vector<1x8xf32>
    %c0_26 = arith.constant 0 : index
    %c2 = arith.constant 2 : index
    %c0_27 = arith.constant 0 : index
    %c0_28 = arith.constant 0 : index
    %26 = vector.load %arg5[%c0_26, %c2, %c0_27, %c0_28] : memref<4x4x8x128xf32, #tpu.memory_space<vmem>>, vector<1x1x8x128xf32>
    %27 = vector.shape_cast %26 : vector<1x1x8x128xf32> to vector<8x128xf32>
    %cst_29 = arith.constant dense<0.000000e+00> : vector<1x128xf32>
    %28 = tpu.matmul %25, %27, %cst_29 {dimension_numbers = #tpu.dot_dimension_numbers<[1], [0], [0], [1], [0, 0, 1, 1], [], []>} : vector<1x8xf32>, vector<8x128xf32>, vector<1x128xf32> -> vector<1x128xf32>
    %29 = arith.addf %23, %28 : vector<1x128xf32>
    %30 = vector.extract_strided_slice %10 {offsets = [0, 3, 0], sizes = [1, 1, 8], strides = [1, 1, 1]} : vector<4x4x8xf32> to vector<1x1x8xf32>
    %31 = vector.shape_cast %30 : vector<1x1x8xf32> to vector<1x8xf32>
    %c0_30 = arith.constant 0 : index
    %c3 = arith.constant 3 : index
    %c0_31 = arith.constant 0 : index
    %c0_32 = arith.constant 0 : index
    %32 = vector.load %arg5[%c0_30, %c3, %c0_31, %c0_32] : memref<4x4x8x128xf32, #tpu.memory_space<vmem>>, vector<1x1x8x128xf32>
    %33 = vector.shape_cast %32 : vector<1x1x8x128xf32> to vector<8x128xf32>
    %cst_33 = arith.constant dense<0.000000e+00> : vector<1x128xf32>
    %34 = tpu.matmul %31, %33, %cst_33 {dimension_numbers = #tpu.dot_dimension_numbers<[1], [0], [0], [1], [0, 0, 1, 1], [], []>} : vector<1x8xf32>, vector<8x128xf32>, vector<1x128xf32> -> vector<1x128xf32>
    %35 = arith.addf %29, %34 : vector<1x128xf32>
    %36 = vector.extract_strided_slice %10 {offsets = [1, 0, 0], sizes = [1, 1, 8], strides = [1, 1, 1]} : vector<4x4x8xf32> to vector<1x1x8xf32>
    %37 = vector.shape_cast %36 : vector<1x1x8xf32> to vector<1x8xf32>
    %c1_34 = arith.constant 1 : index
    %c0_35 = arith.constant 0 : index
    %c0_36 = arith.constant 0 : index
    %c0_37 = arith.constant 0 : index
    %38 = vector.load %arg5[%c1_34, %c0_35, %c0_36, %c0_37] : memref<4x4x8x128xf32, #tpu.memory_space<vmem>>, vector<1x1x8x128xf32>
    %39 = vector.shape_cast %38 : vector<1x1x8x128xf32> to vector<8x128xf32>
    %cst_38 = arith.constant dense<0.000000e+00> : vector<1x128xf32>
    %40 = tpu.matmul %37, %39, %cst_38 {dimension_numbers = #tpu.dot_dimension_numbers<[1], [0], [0], [1], [0, 0, 1, 1], [], []>} : vector<1x8xf32>, vector<8x128xf32>, vector<1x128xf32> -> vector<1x128xf32>
    %41 = arith.addf %35, %40 : vector<1x128xf32>
    %42 = vector.extract_strided_slice %10 {offsets = [1, 1, 0], sizes = [1, 1, 8], strides = [1, 1, 1]} : vector<4x4x8xf32> to vector<1x1x8xf32>
    %43 = vector.shape_cast %42 : vector<1x1x8xf32> to vector<1x8xf32>
    %c1_39 = arith.constant 1 : index
    %c1_40 = arith.constant 1 : index
    %c0_41 = arith.constant 0 : index
    %c0_42 = arith.constant 0 : index
    %44 = vector.load %arg5[%c1_39, %c1_40, %c0_41, %c0_42] : memref<4x4x8x128xf32, #tpu.memory_space<vmem>>, vector<1x1x8x128xf32>
    %45 = vector.shape_cast %44 : vector<1x1x8x128xf32> to vector<8x128xf32>
    %cst_43 = arith.constant dense<0.000000e+00> : vector<1x128xf32>
    %46 = tpu.matmul %43, %45, %cst_43 {dimension_numbers = #tpu.dot_dimension_numbers<[1], [0], [0], [1], [0, 0, 1, 1], [], []>} : vector<1x8xf32>, vector<8x128xf32>, vector<1x128xf32> -> vector<1x128xf32>
    %47 = arith.addf %41, %46 : vector<1x128xf32>
    %48 = vector.extract_strided_slice %10 {offsets = [1, 2, 0], sizes = [1, 1, 8], strides = [1, 1, 1]} : vector<4x4x8xf32> to vector<1x1x8xf32>
    %49 = vector.shape_cast %48 : vector<1x1x8xf32> to vector<1x8xf32>
    %c1_44 = arith.constant 1 : index
    %c2_45 = arith.constant 2 : index
    %c0_46 = arith.constant 0 : index
    %c0_47 = arith.constant 0 : index
    %50 = vector.load %arg5[%c1_44, %c2_45, %c0_46, %c0_47] : memref<4x4x8x128xf32, #tpu.memory_space<vmem>>, vector<1x1x8x128xf32>
    %51 = vector.shape_cast %50 : vector<1x1x8x128xf32> to vector<8x128xf32>
    %cst_48 = arith.constant dense<0.000000e+00> : vector<1x128xf32>
    %52 = tpu.matmul %49, %51, %cst_48 {dimension_numbers = #tpu.dot_dimension_numbers<[1], [0], [0], [1], [0, 0, 1, 1], [], []>} : vector<1x8xf32>, vector<8x128xf32>, vector<1x128xf32> -> vector<1x128xf32>
    %53 = arith.addf %47, %52 : vector<1x128xf32>
    %54 = vector.extract_strided_slice %10 {offsets = [1, 3, 0], sizes = [1, 1, 8], strides = [1, 1, 1]} : vector<4x4x8xf32> to vector<1x1x8xf32>
    %55 = vector.shape_cast %54 : vector<1x1x8xf32> to vector<1x8xf32>
    %c1_49 = arith.constant 1 : index
    %c3_50 = arith.constant 3 : index
    %c0_51 = arith.constant 0 : index
    %c0_52 = arith.constant 0 : index
    %56 = vector.load %arg5[%c1_49, %c3_50, %c0_51, %c0_52] : memref<4x4x8x128xf32, #tpu.memory_space<vmem>>, vector<1x1x8x128xf32>
    %57 = vector.shape_cast %56 : vector<1x1x8x128xf32> to vector<8x128xf32>
    %cst_53 = arith.constant dense<0.000000e+00> : vector<1x128xf32>
    %58 = tpu.matmul %55, %57, %cst_53 {dimension_numbers = #tpu.dot_dimension_numbers<[1], [0], [0], [1], [0, 0, 1, 1], [], []>} : vector<1x8xf32>, vector<8x128xf32>, vector<1x128xf32> -> vector<1x128xf32>
    %59 = arith.addf %53, %58 : vector<1x128xf32>
    %60 = vector.extract_strided_slice %10 {offsets = [2, 0, 0], sizes = [1, 1, 8], strides = [1, 1, 1]} : vector<4x4x8xf32> to vector<1x1x8xf32>
    %61 = vector.shape_cast %60 : vector<1x1x8xf32> to vector<1x8xf32>
    %c2_54 = arith.constant 2 : index
    %c0_55 = arith.constant 0 : index
    %c0_56 = arith.constant 0 : index
    %c0_57 = arith.constant 0 : index
    %62 = vector.load %arg5[%c2_54, %c0_55, %c0_56, %c0_57] : memref<4x4x8x128xf32, #tpu.memory_space<vmem>>, vector<1x1x8x128xf32>
    %63 = vector.shape_cast %62 : vector<1x1x8x128xf32> to vector<8x128xf32>
    %cst_58 = arith.constant dense<0.000000e+00> : vector<1x128xf32>
    %64 = tpu.matmul %61, %63, %cst_58 {dimension_numbers = #tpu.dot_dimension_numbers<[1], [0], [0], [1], [0, 0, 1, 1], [], []>} : vector<1x8xf32>, vector<8x128xf32>, vector<1x128xf32> -> vector<1x128xf32>
    %65 = arith.addf %59, %64 : vector<1x128xf32>
    %66 = vector.extract_strided_slice %10 {offsets = [2, 1, 0], sizes = [1, 1, 8], strides = [1, 1, 1]} : vector<4x4x8xf32> to vector<1x1x8xf32>
    %67 = vector.shape_cast %66 : vector<1x1x8xf32> to vector<1x8xf32>
    %c2_59 = arith.constant 2 : index
    %c1_60 = arith.constant 1 : index
    %c0_61 = arith.constant 0 : index
    %c0_62 = arith.constant 0 : index
    %68 = vector.load %arg5[%c2_59, %c1_60, %c0_61, %c0_62] : memref<4x4x8x128xf32, #tpu.memory_space<vmem>>, vector<1x1x8x128xf32>
    %69 = vector.shape_cast %68 : vector<1x1x8x128xf32> to vector<8x128xf32>
    %cst_63 = arith.constant dense<0.000000e+00> : vector<1x128xf32>
    %70 = tpu.matmul %67, %69, %cst_63 {dimension_numbers = #tpu.dot_dimension_numbers<[1], [0], [0], [1], [0, 0, 1, 1], [], []>} : vector<1x8xf32>, vector<8x128xf32>, vector<1x128xf32> -> vector<1x128xf32>
    %71 = arith.addf %65, %70 : vector<1x128xf32>
    %72 = vector.extract_strided_slice %10 {offsets = [2, 2, 0], sizes = [1, 1, 8], strides = [1, 1, 1]} : vector<4x4x8xf32> to vector<1x1x8xf32>
    %73 = vector.shape_cast %72 : vector<1x1x8xf32> to vector<1x8xf32>
    %c2_64 = arith.constant 2 : index
    %c2_65 = arith.constant 2 : index
    %c0_66 = arith.constant 0 : index
    %c0_67 = arith.constant 0 : index
    %74 = vector.load %arg5[%c2_64, %c2_65, %c0_66, %c0_67] : memref<4x4x8x128xf32, #tpu.memory_space<vmem>>, vector<1x1x8x128xf32>
    %75 = vector.shape_cast %74 : vector<1x1x8x128xf32> to vector<8x128xf32>
    %cst_68 = arith.constant dense<0.000000e+00> : vector<1x128xf32>
    %76 = tpu.matmul %73, %75, %cst_68 {dimension_numbers = #tpu.dot_dimension_numbers<[1], [0], [0], [1], [0, 0, 1, 1], [], []>} : vector<1x8xf32>, vector<8x128xf32>, vector<1x128xf32> -> vector<1x128xf32>
    %77 = arith.addf %71, %76 : vector<1x128xf32>
    %78 = vector.extract_strided_slice %10 {offsets = [2, 3, 0], sizes = [1, 1, 8], strides = [1, 1, 1]} : vector<4x4x8xf32> to vector<1x1x8xf32>
    %79 = vector.shape_cast %78 : vector<1x1x8xf32> to vector<1x8xf32>
    %c2_69 = arith.constant 2 : index
    %c3_70 = arith.constant 3 : index
    %c0_71 = arith.constant 0 : index
    %c0_72 = arith.constant 0 : index
    %80 = vector.load %arg5[%c2_69, %c3_70, %c0_71, %c0_72] : memref<4x4x8x128xf32, #tpu.memory_space<vmem>>, vector<1x1x8x128xf32>
    %81 = vector.shape_cast %80 : vector<1x1x8x128xf32> to vector<8x128xf32>
    %cst_73 = arith.constant dense<0.000000e+00> : vector<1x128xf32>
    %82 = tpu.matmul %79, %81, %cst_73 {dimension_numbers = #tpu.dot_dimension_numbers<[1], [0], [0], [1], [0, 0, 1, 1], [], []>} : vector<1x8xf32>, vector<8x128xf32>, vector<1x128xf32> -> vector<1x128xf32>
    %83 = arith.addf %77, %82 : vector<1x128xf32>
    %84 = vector.extract_strided_slice %10 {offsets = [3, 0, 0], sizes = [1, 1, 8], strides = [1, 1, 1]} : vector<4x4x8xf32> to vector<1x1x8xf32>
    %85 = vector.shape_cast %84 : vector<1x1x8xf32> to vector<1x8xf32>
    %c3_74 = arith.constant 3 : index
    %c0_75 = arith.constant 0 : index
    %c0_76 = arith.constant 0 : index
    %c0_77 = arith.constant 0 : index
    %86 = vector.load %arg5[%c3_74, %c0_75, %c0_76, %c0_77] : memref<4x4x8x128xf32, #tpu.memory_space<vmem>>, vector<1x1x8x128xf32>
    %87 = vector.shape_cast %86 : vector<1x1x8x128xf32> to vector<8x128xf32>
    %cst_78 = arith.constant dense<0.000000e+00> : vector<1x128xf32>
    %88 = tpu.matmul %85, %87, %cst_78 {dimension_numbers = #tpu.dot_dimension_numbers<[1], [0], [0], [1], [0, 0, 1, 1], [], []>} : vector<1x8xf32>, vector<8x128xf32>, vector<1x128xf32> -> vector<1x128xf32>
    %89 = arith.addf %83, %88 : vector<1x128xf32>
    %90 = vector.extract_strided_slice %10 {offsets = [3, 1, 0], sizes = [1, 1, 8], strides = [1, 1, 1]} : vector<4x4x8xf32> to vector<1x1x8xf32>
    %91 = vector.shape_cast %90 : vector<1x1x8xf32> to vector<1x8xf32>
    %c3_79 = arith.constant 3 : index
    %c1_80 = arith.constant 1 : index
    %c0_81 = arith.constant 0 : index
    %c0_82 = arith.constant 0 : index
    %92 = vector.load %arg5[%c3_79, %c1_80, %c0_81, %c0_82] : memref<4x4x8x128xf32, #tpu.memory_space<vmem>>, vector<1x1x8x128xf32>
    %93 = vector.shape_cast %92 : vector<1x1x8x128xf32> to vector<8x128xf32>
    %cst_83 = arith.constant dense<0.000000e+00> : vector<1x128xf32>
    %94 = tpu.matmul %91, %93, %cst_83 {dimension_numbers = #tpu.dot_dimension_numbers<[1], [0], [0], [1], [0, 0, 1, 1], [], []>} : vector<1x8xf32>, vector<8x128xf32>, vector<1x128xf32> -> vector<1x128xf32>
    %95 = arith.addf %89, %94 : vector<1x128xf32>
    %96 = vector.extract_strided_slice %10 {offsets = [3, 2, 0], sizes = [1, 1, 8], strides = [1, 1, 1]} : vector<4x4x8xf32> to vector<1x1x8xf32>
    %97 = vector.shape_cast %96 : vector<1x1x8xf32> to vector<1x8xf32>
    %c3_84 = arith.constant 3 : index
    %c2_85 = arith.constant 2 : index
    %c0_86 = arith.constant 0 : index
    %c0_87 = arith.constant 0 : index
    %98 = vector.load %arg5[%c3_84, %c2_85, %c0_86, %c0_87] : memref<4x4x8x128xf32, #tpu.memory_space<vmem>>, vector<1x1x8x128xf32>
    %99 = vector.shape_cast %98 : vector<1x1x8x128xf32> to vector<8x128xf32>
    %cst_88 = arith.constant dense<0.000000e+00> : vector<1x128xf32>
    %100 = tpu.matmul %97, %99, %cst_88 {dimension_numbers = #tpu.dot_dimension_numbers<[1], [0], [0], [1], [0, 0, 1, 1], [], []>} : vector<1x8xf32>, vector<8x128xf32>, vector<1x128xf32> -> vector<1x128xf32>
    %101 = arith.addf %95, %100 : vector<1x128xf32>
    %102 = vector.extract_strided_slice %10 {offsets = [3, 3, 0], sizes = [1, 1, 8], strides = [1, 1, 1]} : vector<4x4x8xf32> to vector<1x1x8xf32>
    %103 = vector.shape_cast %102 : vector<1x1x8xf32> to vector<1x8xf32>
    %c3_89 = arith.constant 3 : index
    %c3_90 = arith.constant 3 : index
    %c0_91 = arith.constant 0 : index
    %c0_92 = arith.constant 0 : index
    %104 = vector.load %arg5[%c3_89, %c3_90, %c0_91, %c0_92] : memref<4x4x8x128xf32, #tpu.memory_space<vmem>>, vector<1x1x8x128xf32>
    %105 = vector.shape_cast %104 : vector<1x1x8x128xf32> to vector<8x128xf32>
    %cst_93 = arith.constant dense<0.000000e+00> : vector<1x128xf32>
    %106 = tpu.matmul %103, %105, %cst_93 {dimension_numbers = #tpu.dot_dimension_numbers<[1], [0], [0], [1], [0, 0, 1, 1], [], []>} : vector<1x8xf32>, vector<8x128xf32>, vector<1x128xf32> -> vector<1x128xf32>
    %107 = arith.addf %101, %106 : vector<1x128xf32>
    %108 = math.tanh %107 : vector<1x128xf32>
    %c0_94 = arith.constant 0 : index
    %c0_95 = arith.constant 0 : index
    %109 = vector.load %arg7[%c0_94, %c0_95] : memref<1x128xf32, #tpu.memory_space<vmem>>, vector<1x128xf32>
    tpu.vector_store %arg7[%c0_94, %c0_95], %108 {strides = array<i32>} : memref<1x128xf32, #tpu.memory_space<vmem>>, vector<1x128xf32>,
    return
  }
}

</mosaic_0001>

<bundles_post_ra>
// kernel: _lambda_.1
= control target key start
LH: loop header
LB: loop body
LE: loop exit
PB: predicated region body
PF: predicated region fallthrough
CT: control target
= control target key end

     0   :  { %12 = vsyncpa [#allocation3], 0  ;;  %s2278_s24 = smov [#allocation2]   ;;  %s2558_s0 = inlined_call_operand.vmem [shape: f32[4,16,8], index: 0, kind: input, shape index: {}]   ;;  %s2559_s1 = inlined_call_operand.vmem [shape: f32[4,16,16], index: 1, kind: input, shape index: {}]   ;;  %s2560_s2 = inlined_call_operand.vmem [shape: f32[4,16,8], index: 2, kind: input, shape index: {}]   ;;  %s2561_s3 = inlined_call_operand.vmem [shape: f32[4,4,16], index: 3, kind: input, shape index: {}]   ;;  %s2562_s4 = inlined_call_operand.hbm [shape: f32[4,4,8], index: 4, kind: input, shape index: {}]   ;;  %s2563_s5 = inlined_call_operand.vmem [shape: f32[4,4,8,128], index: 5, kind: input, shape index: {}]   ;;  %s2564_s6 = inlined_call_operand.vmem [shape: f32[1,128], index: 6, kind: input, shape index: {}]   ;;  %s2565_s7 = inlined_call_operand.vmem [shape: f32[1,128], index: 7, kind: output, shape index: {}]  }
   0x1   :  { %s26_s25 = sshll.u32 %s2278_s24, 4  ;;  %s2254_s28 = scalar_lea.hbm %s2562_s4, 256  ;;  %s27_s25 = int_to_ptr.vmem [resolvable:$true] %s26_s25 }
   0x2   :  { %p2255_p0 = scmp.ne.s32.totalorder %s2562_s4, %s2254_s28  ;;  %p2258_p1 = scmp.lt.u32.totalorder %s2254_s28, %s2562_s4 }
   0x4   :  { %p2260_p2 = pnand %p2258_p1, %p2255_p0 }
   0x6   :  { %2263 = shalt.err (!%p2260_p2)
}
   0x7   :  { %s2264_s10 = scalar_lea.vmem %s27_s25, 256  ;;  %p2269_p4 = scmp.lt.s32.totalorder %s27_s25, %s27_s25 }
   0x8   :  { %p2265_p3 = scmp.ne.s32.totalorder %s27_s25, %s2264_s10  ;;  %p2270_p5 = scmp.lt.s32.totalorder %s2264_s10, %s2264_s10 }
   0xa   :  { %p2271_p6 = por %p2270_p5, %p2269_p4 }
   0xc   :  { %p2272_p7 = pnand %p2271_p6, %p2265_p3 }
   0xe   :  { %2275 = shalt.err (!%p2272_p7)
}
   0xf   :  { %s2279_s11 = smov 64   ;;  %s2280_s12 = smov 4  }
  0x10   :  { %32 = dma.hbm_to_vmem [thread:$0]  %s2562_s4, 256, %s27_s25, [#allocation3], %s2279_s11, %s2279_s11, %s2280_s12  }
  0x11   :  { %2276 = dma.done.wait [#allocation3], 256  }
  0x12   :  { %2277 = vsyncadd [#allocation3], 4294967040  ;;  %vm64_vm0 = vcmask 130048   ;;  %v48_v0 = vld [vmem:[%s2558_s0] sm:$0xff]  ;;  %v49_v1 = vld [vmem:[%s2558_s0 + $0x8] sm:$0xff]  ;;  %v2281_v20 = vmov 0.0|0.0  }
  0x13   :  { %v40_v2 = vld [vmem:[%s2559_s1] sm:$0xff]  ;;  %v2164_v3 = vpack.c.bf16 %v49_v1, %v48_v0  ;;  %v50_v4 = vld [vmem:[%s2558_s0 + $0x10] sm:$0xff]  ;;  %v51_v5 = vld [vmem:[%s2558_s0 + $0x18] sm:$0xff]  ;;  %vm2282_vm1 = vmmov 0   ;;  %v2283_v21 = vmov 0.0   ;;  %vm703_vm2 = vcmask 64512  }
  0x14   :  { %2032 = vmatprep.mubr.msk.f32.mxu1 %vm64_vm0, %v40_v2  ;;  %v2168_v6 = vpack.c.bf16 %v51_v5, %v50_v4  ;;  %v52_v7 = vld [vmem:[%s2558_s0 + $0x20] sm:$0xff]  ;;  %v53_v8 = vld [vmem:[%s2558_s0 + $0x28] sm:$0xff]  ;;  %v42_v10 = vld [vmem:[%s2559_s1 + $0x10] sm:$0xff]  ;;  %2104 = vmatprep.subr.mxu0 %v2283_v21 }
  0x15   :  { %2165 = vmatprep.subr.bf16.mxu1 %v2164_v3  ;;  %v41_v9 = vld [vmem:[%s2559_s1 + $0x8] sm:$0xff]  ;;  %v2172_v11 = vpack.c.bf16 %v53_v8, %v52_v7  ;;  %v54_v12 = vld [vmem:[%s2558_s0 + $0x30] sm:$0xff]  ;;  %v55_v13 = vld [vmem:[%s2558_s0 + $0x38] sm:$0xff]  ;;  %2106 = vmatprep.mubr.msk.f32.mxu0 %vm2282_vm1, %v2283_v21 }
  0x16   :  { %2167 = vmatpush3.bf16.msra.mxu1 %v2164_v3  ;;  %v43_v14 = vld [vmem:[%s2559_s1 + $0x18] sm:$0xff]  ;;  %v44_v15 = vld [vmem:[%s2559_s1 + $0x20] sm:$0xff]  ;;  %v2176_v16 = vpack.c.bf16 %v55_v13, %v54_v12  ;;  %v45_v17 = vld [vmem:[%s2559_s1 + $0x28] sm:$0xff] }
  0x17   :  { %2169 = vmatprep.subr.bf16.mxu1 %v2168_v6  ;;  %v46_v18 = vld [vmem:[%s2559_s1 + $0x30] sm:$0xff]  ;;  %v47_v19 = vld [vmem:[%s2559_s1 + $0x38] sm:$0xff]  ;;  %v57_v22 = vld [vmem:[%s2560_s2 + $0x8] sm:$0xff] }
  0x18   :  { %v56_v23 = vld [vmem:[%s2560_s2] sm:$0xff]  ;;  %v59_v28 = vld [vmem:[%s2560_s2 + $0x18] sm:$0xff]  ;;  %v58_v29 = vld [vmem:[%s2560_s2 + $0x10] sm:$0xff] }
  0x19   :  { %2033 = vmatmul.mubr.msk.f32.vlgmr.msra.gmra.mrb[0].mxu1 %vm64_vm0, %v41_v9  ;;  %v61_v34 = vld [vmem:[%s2560_s2 + $0x28] sm:$0xff]  ;;  %v60_v35 = vld [vmem:[%s2560_s2 + $0x20] sm:$0xff]  ;;  %v63_v40 = vld [vmem:[%s2560_s2 + $0x38] sm:$0xff] }
  0x1a   :  { %2171 = vmatpush3.bf16.msra.mxu1 %v2168_v6  ;;  %2039 = vmatprep.mubr.msk.f32.mxu1 %vm64_vm0, %v42_v10  ;;  %v62_v41 = vld [vmem:[%s2560_s2 + $0x30] sm:$0xff]  ;;  %v397_v50 = vld [vmem:[%s2561_s3] sm:$0xf]  ;;  %v398_v54 = vld [vmem:[%s2561_s3 + $0x4] sm:$0xf] }
  0x1b   :  { %2173 = vmatprep.subr.bf16.mxu1 %v2172_v11  ;;  %v399_v58 = vld [vmem:[%s2561_s3 + $0x8] sm:$0xf]  ;;  %v400_v61 = vld [vmem:[%s2561_s3 + $0xc] sm:$0xf]  ;;  %v702_v62 = vld [vmem:[%s2563_s5] sm:$0xff] }
  0x1c   :  { %v1944_v63 = vld [vmem:[%s2563_s5 + $0x20] sm:$0xff]  ;;  %v1938_v10 = vld [vmem:[%s2563_s5 + $0x8] sm:$0xff] }
  0x1d   :  { %2040 = vmatmul.mubr.msk.f32.vlgmr.msra.gmra.mrb[2].mxu1 %vm64_vm0, %v43_v14  ;;  %2105 = vmatpush3.msra.mxu0 %v1944_v63  ;;  %v401_v0 = vld [vmem:[#allocation2] sm:$0xf]  ;;  %v402_v4 = vld [vmem:[#allocation2 + $0x4] sm:$0xf]  ;;  %v1946_v14 = vld [vmem:[%s2563_s5 + $0x28] sm:$0xff] }
  0x1e   :  { %2175 = vmatpush3.bf16.msra.mxu1 %v2172_v11  ;;  %2046 = vmatprep.mubr.msk.f32.mxu1 %vm64_vm0, %v44_v15 }
  0x1f   :  { %2177 = vmatprep.subr.bf16.mxu1 %v2176_v16  ;;  %2109 = vmatprep.subr.mxu0 %v2283_v21 }
  0x21   :  { %2047 = vmatmul.mubr.msk.f32.vlgmr.msra.gmra.mrb[4].mxu1 %vm64_vm0, %v45_v17  ;;  %v1940_v17 = vld [vmem:[%s2563_s5 + $0x10] sm:$0xff] }
  0x22   :  { %2179 = vmatpush3.bf16.msra.mxu1 %v2176_v16  ;;  %2053 = vmatprep.mubr.msk.f32.mxu1 %vm64_vm0, %v46_v18 }
  0x23   :  { %2180 = vmatprep.subr.bf16.mxu1 %v2281_v20 }
  0x25   :  { %2054 = vmatmul.mubr.msk.f32.vlgmr.msra.gmra.mrb[6].mxu1 %vm64_vm0, %v47_v19  ;;  %v1948_v19 = vld [vmem:[%s2563_s5 + $0x30] sm:$0xff] }
  0x26   :  { %2060 = vmatprep.mubr.msk.f32.mxu1 %vm2282_vm1, %v2283_v21 }
  0xec   :  { %v2034_v24 = vpop.f32.mrb[0].mxu1 }
  0xed   :  { %v143_v25 = vadd.f32 %v2034_v24, %v57_v22  ;;  %v137_v26 = vpop.f32.mrb[1].mxu1  ;;  %v1942_v22 = vld [vmem:[%s2563_s5 + $0x18] sm:$0xff] }
  0xee   :  { %v138_v27 = vadd.f32 %v137_v26, %v56_v23  ;;  %v403_v23 = vld [vmem:[#allocation2 + $0x8] sm:$0xf] }
  0xef   :  { %2228 = vtanh.f32 %v143_v25  ;;  %v1950_v25 = vld [vmem:[%s2563_s5 + $0x38] sm:$0xff] }
  0xf0   :  { %2230 = vtanh.f32 %v138_v27  ;;  %v2041_v30 = vpop.f32.mrb[2].mxu1 }
  0xf1   :  { %v224_v31 = vadd.f32 %v2041_v30, %v59_v28  ;;  %v218_v32 = vpop.f32.mrb[3].mxu1 }
  0xf2   :  { %v219_v33 = vadd.f32 %v218_v32, %v58_v29  ;;  %v1952_v29 = vld [vmem:[%s2563_s5 + $0x40] sm:$0xff] }
  0xf3   :  { %2232 = vtanh.f32 %v224_v31  ;;  %v1954_v31 = vld [vmem:[%s2563_s5 + $0x48] sm:$0xff] }
  0xf4   :  { %2234 = vtanh.f32 %v219_v33  ;;  %v2048_v36 = vpop.f32.mrb[4].mxu1  ;;  %v1956_v33 = vld [vmem:[%s2563_s5 + $0x50] sm:$0xff] }
  0xf5   :  { %v305_v37 = vadd.f32 %v2048_v36, %v61_v34  ;;  %v299_v38 = vpop.f32.mrb[5].mxu1  ;;  %v404_v34 = vld [vmem:[#allocation2 + $0xc] sm:$0xf]  ;;  %v1958_v36 = vld [vmem:[%s2563_s5 + $0x58] sm:$0xff] }
  0xf6   :  { %v300_v39 = vadd.f32 %v299_v38, %v60_v35 }
  0xf7   :  { %2236 = vtanh.f32 %v305_v37 }
  0xf8   :  { %2238 = vtanh.f32 %v300_v39  ;;  %v2055_v42 = vpop.f32.mrb[6].mxu1  ;;  %v1960_v39 = vld [vmem:[%s2563_s5 + $0x60] sm:$0xff] }
  0xf9   :  { %v2229_v43 = vpop.eup %2228  ;;  %v386_v44 = vadd.f32 %v2055_v42, %v63_v40  ;;  %v380_v45 = vpop.f32.mrb[7].mxu1 }
  0xfa   :  { %v2231_v46 = vpop.eup %2230  ;;  %v381_v47 = vadd.f32 %v380_v45, %v62_v41  ;;  %v1962_v41 = vld [vmem:[%s2563_s5 + $0x68] sm:$0xff]  ;;  %v1966_v45 = vld [vmem:[%s2563_s5 + $0x78] sm:$0xff] }
  0xfb   :  { %v2181_v48 = vpack.c.bf16 %v2229_v43, %v2231_v46  ;;  %2240 = vtanh.f32 %v386_v44  ;;  %v1964_v43 = vld [vmem:[%s2563_s5 + $0x70] sm:$0xff] }
  0xfc   :  { %2242 = vtanh.f32 %v381_v47 }
  0xfd   :  { %v2233_v49 = vpop.eup %2232  ;;  %2182 = vmatpush3.bf16.msra.mxu1 %v2181_v48 }
  0xfe   :  { %v2235_v51 = vpop.eup %2234  ;;  %2183 = vmatprep.subr.bf16.mxu1 %v2281_v20 }
  0xff   :  { %v2184_v52 = vpack.c.bf16 %v2233_v49, %v2235_v51  ;;  %v701_v49 = vld [vmem:[%s2564_s6] sm:$0x1] }
 0x100   :  { %2061 = vmatmul.mubr.msk.f32.vlgmr.msra.gmra.mrb[8].mxu1 %vm64_vm0, %v397_v50 }
 0x101   :  { %v2237_v53 = vpop.eup %2236  ;;  %2185 = vmatpush3.bf16.msra.mxu1 %v2184_v52  ;;  %2067 = vmatprep.mubr.msk.f32.mxu1 %vm2282_vm1, %v2283_v21 }
 0x102   :  { %v2239_v55 = vpop.eup %2238  ;;  %2186 = vmatprep.subr.bf16.mxu1 %v2281_v20 }
 0x103   :  { %v2187_v56 = vpack.c.bf16 %v2237_v53, %v2239_v55 }
 0x104   :  { %2068 = vmatmul.mubr.msk.f32.vlgmr.msra.gmra.mrb[10].mxu1 %vm64_vm0, %v398_v54 }
 0x105   :  { %v2241_v57 = vpop.eup %2240  ;;  %2188 = vmatpush3.bf16.msra.mxu1 %v2187_v56  ;;  %2074 = vmatprep.mubr.msk.f32.mxu1 %vm2282_vm1, %v2283_v21 }
 0x106   :  { %v2243_v59 = vpop.eup %2242  ;;  %2189 = vmatprep.subr.bf16.mxu1 %v2281_v20 }
 0x107   :  { %v2190_v60 = vpack.c.bf16 %v2241_v57, %v2243_v59 }
 0x108   :  { %2075 = vmatmul.mubr.msk.f32.vlgmr.msra.gmra.mrb[12].mxu1 %vm64_vm0, %v399_v58 }
 0x109   :  { %2191 = vmatpush3.bf16.msra.mxu1 %v2190_v60  ;;  %2081 = vmatprep.mubr.msk.f32.mxu1 %vm2282_vm1, %v2283_v21 }
 0x10a   :  { %2084 = vmatprep.subr.mxu1 %v2283_v21 }
 0x10c   :  { %2082 = vmatmul.mubr.msk.f32.vlgmr.msra.gmra.mrb[14].mxu1 %vm64_vm0, %v400_v61 }
 0x10d   :  { %2086 = vmatprep.mubr.msk.f32.mxu1 %vm2282_vm1, %v2283_v21  ;;  %2085 = vmatpush3.msra.mxu1 %v702_v62 }
 0x10e   :  { %2089 = vmatprep.subr.mxu1 %v2283_v21 }
 0x1d3   :  { %v474_v1 = vpop.f32.mrb[8].mxu1 }
 0x1d4   :  { %v475_v2 = vadd.f32 %v474_v1, %v401_v0  ;;  %v2062_v3 = vpop.f32.mrb[9].mxu1 }
 0x1d6   :  { %2244 = vtanh.f32 %v475_v2 }
 0x1d7   :  { %v547_v5 = vpop.f32.mrb[10].mxu1 }
 0x1d8   :  { %v548_v6 = vadd.f32 %v547_v5, %v402_v4  ;;  %v2069_v7 = vpop.f32.mrb[11].mxu1 }
 0x1da   :  { %2246 = vtanh.f32 %v548_v6 }
 0x1db   :  { %v620_v8 = vpop.f32.mrb[12].mxu1 }
 0x1dc   :  { %v2076_v9 = vpop.f32.mrb[13].mxu1  ;;  %v621_v26 = vadd.f32 %v620_v8, %v403_v23 }
 0x1de   :  { %2248 = vtanh.f32 %v621_v26 }
 0x1df   :  { %v693_v11 = vpop.f32.mrb[14].mxu1 }
 0x1e0   :  { %v2245_v12 = vpop.eup %2244  ;;  %v2083_v13 = vpop.f32.mrb[15].mxu1  ;;  %v694_v37 = vadd.f32 %v693_v11, %v404_v34 }
 0x1e1   :  { %2087 = vmatmul.mubr.msk.f32.vlgmr.msra.gmra.mrb[16].mxu1 %vm703_vm2, %v2245_v12  ;;  %v780_v16 = vrot.slane %v2245_v12, 1  ;;  %v856_v20 = vrot.slane %v2245_v12, 2  ;;  %v932_v27 = vrot.slane %v2245_v12, 3 }
 0x1e2   :  { %2090 = vmatpush3.msra.mxu1 %v1938_v10  ;;  %2091 = vmatprep.mubr.msk.f32.mxu1 %vm2282_vm1, %v2283_v21  ;;  %2250 = vtanh.f32 %v694_v37 }
 0x1e3   :  { %2094 = vmatprep.subr.mxu1 %v2283_v21 }
 0x1e4   :  { %v2247_v15 = vpop.eup %2246 }
 0x1e5   :  { %2107 = vmatmul.mubr.msk.f32.vlgmr.msra.gmra.mrb[0].mxu0 %vm703_vm2, %v2247_v15  ;;  %v1084_v18 = vrot.slane %v2247_v15, 1  ;;  %v1160_v24 = vrot.slane %v2247_v15, 2  ;;  %v1236_v28 = vrot.slane %v2247_v15, 3 }
 0x1e6   :  { %2110 = vmatpush3.msra.mxu0 %v1946_v14  ;;  %2111 = vmatprep.mubr.msk.f32.mxu0 %vm2282_vm1, %v2283_v21 }
 0x1e7   :  { %2114 = vmatprep.subr.mxu0 %v2283_v21 }
 0x1e8   :  { %v2249_v30 = vpop.eup %2248 }
 0x1e9   :  { %2092 = vmatmul.mubr.msk.f32.vlgmr.msra.gmra.mrb[16].mxu1 %vm703_vm2, %v780_v16  ;;  %v1388_v32 = vrot.slane %v2249_v30, 1  ;;  %v1464_v35 = vrot.slane %v2249_v30, 2  ;;  %v1540_v38 = vrot.slane %v2249_v30, 3 }
 0x1ea   :  { %2095 = vmatpush3.msra.mxu1 %v1940_v17  ;;  %2096 = vmatprep.mubr.msk.f32.mxu1 %vm2282_vm1, %v2283_v21 }
 0x1eb   :  { %2099 = vmatprep.subr.mxu1 %v2283_v21 }
 0x1ec   :  { %v2251_v40 = vpop.eup %2250 }
 0x1ed   :  { %2112 = vmatmul.mubr.msk.f32.vlgmr.msra.gmra.mrb[0].mxu0 %vm703_vm2, %v1084_v18  ;;  %v1692_v42 = vrot.slane %v2251_v40, 1  ;;  %v1768_v44 = vrot.slane %v2251_v40, 2  ;;  %v1844_v46 = vrot.slane %v2251_v40, 3 }
 0x1ee   :  { %2115 = vmatpush3.msra.mxu0 %v1948_v19  ;;  %2116 = vmatprep.mubr.msk.f32.mxu0 %vm2282_vm1, %v2283_v21 }
 0x1ef   :  { %2119 = vmatprep.subr.mxu0 %v2283_v21 }
 0x1f1   :  { %2097 = vmatmul.mubr.msk.f32.vlgmr.msra.gmra.mrb[16].mxu1 %vm703_vm2, %v856_v20 }
 0x1f2   :  { %2100 = vmatpush3.msra.mxu1 %v1942_v22  ;;  %2101 = vmatprep.mubr.msk.f32.mxu1 %vm2282_vm1, %v2283_v21 }
 0x1f5   :  { %2117 = vmatmul.mubr.msk.f32.vlgmr.msra.gmra.mrb[0].mxu0 %vm703_vm2, %v1160_v24 }
 0x1f6   :  { %2120 = vmatpush3.msra.mxu0 %v1950_v25  ;;  %2121 = vmatprep.mubr.msk.f32.mxu0 %vm2282_vm1, %v2283_v21 }
 0x1f7   :  { %2124 = vmatprep.subr.mxu0 %v2283_v21 }
 0x1f9   :  { %2102 = vmatmul.mubr.msk.f32.vlgmr.msra.gmra.mrb[16].mxu1 %vm703_vm2, %v932_v27 }
 0x1fd   :  { %2122 = vmatmul.mubr.msk.f32.vlgmr.msra.gmra.mrb[0].mxu0 %vm703_vm2, %v1236_v28 }
 0x1fe   :  { %2125 = vmatpush3.msra.mxu0 %v1952_v29  ;;  %2126 = vmatprep.mubr.msk.f32.mxu0 %vm2282_vm1, %v2283_v21 }
 0x1ff   :  { %2129 = vmatprep.subr.mxu0 %v2283_v21 }
 0x205   :  { %2127 = vmatmul.mubr.msk.f32.vlgmr.msra.gmra.mrb[0].mxu0 %vm703_vm2, %v2249_v30 }
 0x206   :  { %2130 = vmatpush3.msra.mxu0 %v1954_v31  ;;  %2131 = vmatprep.mubr.msk.f32.mxu0 %vm2282_vm1, %v2283_v21 }
 0x207   :  { %2134 = vmatprep.subr.mxu0 %v2283_v21 }
 0x20d   :  { %2132 = vmatmul.mubr.msk.f32.vlgmr.msra.gmra.mrb[0].mxu0 %vm703_vm2, %v1388_v32 }
 0x20e   :  { %2135 = vmatpush3.msra.mxu0 %v1956_v33  ;;  %2136 = vmatprep.mubr.msk.f32.mxu0 %vm2282_vm1, %v2283_v21 }
 0x20f   :  { %2139 = vmatprep.subr.mxu0 %v2283_v21 }
 0x215   :  { %2137 = vmatmul.mubr.msk.f32.vlgmr.msra.gmra.mrb[0].mxu0 %vm703_vm2, %v1464_v35 }
 0x216   :  { %2140 = vmatpush3.msra.mxu0 %v1958_v36  ;;  %2141 = vmatprep.mubr.msk.f32.mxu0 %vm2282_vm1, %v2283_v21 }
 0x217   :  { %2144 = vmatprep.subr.mxu0 %v2283_v21 }
 0x21d   :  { %2142 = vmatmul.mubr.msk.f32.vlgmr.msra.gmra.mrb[0].mxu0 %vm703_vm2, %v1540_v38 }
 0x21e   :  { %2145 = vmatpush3.msra.mxu0 %v1960_v39  ;;  %2146 = vmatprep.mubr.msk.f32.mxu0 %vm2282_vm1, %v2283_v21 }
 0x21f   :  { %2149 = vmatprep.subr.mxu0 %v2283_v21 }
 0x225   :  { %2147 = vmatmul.mubr.msk.f32.vlgmr.msra.gmra.mrb[0].mxu0 %vm703_vm2, %v2251_v40 }
 0x226   :  { %2150 = vmatpush3.msra.mxu0 %v1962_v41  ;;  %2151 = vmatprep.mubr.msk.f32.mxu0 %vm2282_vm1, %v2283_v21 }
 0x227   :  { %2154 = vmatprep.subr.mxu0 %v2283_v21 }
 0x22d   :  { %2152 = vmatmul.mubr.msk.f32.vlgmr.msra.gmra.mrb[0].mxu0 %vm703_vm2, %v1692_v42 }
 0x22e   :  { %2155 = vmatpush3.msra.mxu0 %v1964_v43  ;;  %2156 = vmatprep.mubr.msk.f32.mxu0 %vm2282_vm1, %v2283_v21 }
 0x22f   :  { %2159 = vmatprep.subr.mxu0 %v2283_v21 }
 0x235   :  { %2157 = vmatmul.mubr.msk.f32.vlgmr.msra.gmra.mrb[0].mxu0 %vm703_vm2, %v1768_v44 }
 0x236   :  { %2160 = vmatpush3.msra.mxu0 %v1966_v45  ;;  %2161 = vmatprep.mubr.msk.f32.mxu0 %vm2282_vm1, %v2283_v21 }
 0x23d   :  { %2162 = vmatmul.mubr.msk.f32.vlgmr.msra.gmra.mrb[0].mxu0 %vm703_vm2, %v1844_v46 }
 0x2cc   :  { %v1001_v47 = vpop.f32.mrb[16].mxu1 }
 0x2cd   :  { %v2103_v48 = vpop.f32.mrb[17].mxu1  ;;  %v2192_v50 = vadd.f32 %v1001_v47, %v701_v49 }
 0x310   :  { %v1913_v51 = vpop.f32.mrb[0].mxu0 }
 0x311   :  { %v2193_v52 = vadd.f32 %v2192_v50, %v1913_v51  ;;  %v2163_v53 = vpop.f32.mrb[1].mxu0 }
 0x313   :  { %2252 = vtanh.f32 %v2193_v52 }
 0x31d   :  { %v2253_v54 = vpop.eup %2252 }
 0x31e   :  { %1919 = vst [vmem:[%s2565_s7] sm:$0x1] %v2253_v54 }
 0x31f   :  { %1924 = vsyncpa [#allocation3], 1 }

</bundles_post_ra>
